<compile_context>
chip_gen: v7x
topology: tpu7x:2x2x1
jax: 0.10.0
libtpu: 0.0.40
codegen_flags: <defaults>
</compile_context>

<pallas_src>
import jax
import jax.numpy as jnp
from jax.experimental import pallas as pl
from jax.experimental.pallas import tpu as pltpu

_LANE = 128
_SUBLANE = 8
_TARGET_BLOCK_BYTES = 4 << 20   # ~4 MiB per block per operand
_VMEM_LIMIT_BYTES = 40 << 20    # explicit scoped-VMEM budget (all generations)


def _round_up(v: int, m: int) -> int:
    return ((v + m - 1) // m) * m


def _expo_soft_kernel(x_ref, o_ref):
    # All math in f32 (v5e has no bf16 VPU/EUP path anyway).
    x = x_ref[...].astype(jnp.float32)
    ax = jnp.abs(x)
    # softsign(x) * exp(-|x|)  ==  x * exp(-|x|) * 1/(1 + |x|)
    # Approx reciprocal runs on the EUP slot (free filler under the HBM bound,
    # small win on v7x where memory time per vreg shrinks).
    inv = pl.reciprocal(1.0 + ax, approx=True)
    o_ref[...] = (x * jnp.exp(-ax) * inv).astype(o_ref.dtype)


def expo_soft(x, *, target_block_bytes: int = _TARGET_BLOCK_BYTES):
    """Elementwise Pallas kernel: softsign(x) * exp(-|x|)."""
    orig_shape = x.shape
    orig_dtype = x.dtype
    n = x.size
    if n == 0:
        return x

    flat = x.reshape(-1)

    # Lane-only padding (multiple of 128).  Sublane remainder is absorbed by
    # the masked edge block of the cdiv grid, so no 8*128 over-padding.
    pad = (-n) % _LANE
    if pad:
        flat = jnp.pad(flat, (0, pad))
    rows = flat.shape[0] // _LANE
    x2d = flat.reshape(rows, _LANE)

    # Dtype-aware sublane granularity: sub-32-bit dtypes pack along sublanes
    # (bf16 -> 16, int8/fp8 -> 32), keeping loads/stores unmasked.
    itemsize = jnp.dtype(orig_dtype).itemsize
    packing = max(1, 4 // itemsize)
    sub_mult = _SUBLANE * packing

    # ~4 MiB per block regardless of dtype (8192 rows f32 / 16384 bf16 / ...).
    block_rows = max(sub_mult, target_block_bytes // (_LANE * itemsize))

    # Ensure >=2 grid steps whenever possible so v7x megacore can shard the
    # parallel axis across both TensorCores; keep br a sublane multiple.
    half = _round_up(pl.cdiv(rows, 2), sub_mult)
    br = min(block_rows, half)
    if br >= rows:
        br = rows  # tiny input: single full-extent block (layout-legal)
    grid = (pl.cdiv(rows, br),)

    out2d = pl.pallas_call(
        _expo_soft_kernel,
        out_shape=jax.ShapeDtypeStruct((rows, _LANE), orig_dtype),
        grid=grid,
        in_specs=[pl.BlockSpec((br, _LANE), lambda i: (i, 0))],
        out_specs=pl.BlockSpec((br, _LANE), lambda i: (i, 0)),
        compiler_params=pltpu.CompilerParams(
            dimension_semantics=("parallel",),
            vmem_limit_bytes=_VMEM_LIMIT_BYTES,
        ),
    )(x2d)

    out_flat = out2d.reshape(-1)
    if pad:
        out_flat = out_flat[:n]
    return out_flat.reshape(orig_shape)


def _reference_jax(x):
    """Pure-JAX reference mirroring the PyTorch module (exact divide)."""
    x32 = x.astype(jnp.float32)
    ax = jnp.abs(x32)
    return ((x32 / (1.0 + ax)) * jnp.exp(-ax)).astype(x.dtype)


if __name__ == "__main__":
    key = jax.random.PRNGKey(0)

    # Small NCHW input matching the module's typical use (2-step grid).
    x = jax.random.normal(key, (2, 4, 16, 16), dtype=jnp.float32)
    out = jax.block_until_ready(expo_soft(x))
    ref = _reference_jax(x)
    assert out.shape == x.shape and out.dtype == x.dtype
    # Tolerance relaxed for the approx (EUP) reciprocal; |f(x)| <= ~0.24.
    assert jnp.allclose(out, ref, atol=5e-3, rtol=5e-3)

    # Larger input: 4 MiB blocks, multi-step grid.
    x_big = jax.random.normal(jax.random.PRNGKey(1), (8, 64, 64, 64),
                              dtype=jnp.float32)
    out_big = jax.block_until_ready(expo_soft(x_big))
    assert jnp.allclose(out_big, _reference_jax(x_big), atol=5e-3, rtol=5e-3)

    # Ragged shape: exercises lane-only pad + masked edge block.
    x_rag = jax.random.normal(jax.random.PRNGKey(2), (3, 5, 7),
                              dtype=jnp.float32)
    out_rag = jax.block_until_ready(expo_soft(x_rag))
    assert out_rag.shape == x_rag.shape
    assert jnp.allclose(out_rag, _reference_jax(x_rag), atol=5e-3, rtol=5e-3)

    # bf16 input: exercises dtype-aware sublane granularity (sub_mult=16).
    x_bf = jax.random.normal(jax.random.PRNGKey(3), (2, 4, 16, 16),
                             dtype=jnp.bfloat16)
    out_bf = jax.block_until_ready(expo_soft(x_bf))
    assert out_bf.dtype == jnp.bfloat16
    assert jnp.allclose(out_bf.astype(jnp.float32),
                        _reference_jax(x_bf).astype(jnp.float32),
                        atol=1e-2, rtol=1e-2)

    print("KERNEL_OK")
</pallas_src>

<mosaic_0001>
module attributes {stable_mosaic.version = 11 : i64} {
  func.func @_expo_soft_kernel(%arg0: i32, %arg1: memref<8x128xf32, #tpu.memory_space<vmem>>, %arg2: memref<8x128xf32, #tpu.memory_space<vmem>>) attributes {dimension_semantics = [#tpu.dimension_semantics<parallel>], iteration_bounds = array<i64: 2>, scalar_prefetch = 0 : i64, scratch_operands = 0 : i64, tpu.core_type = #tpu.core_type<tc>, window_params = [{transform_indices = @transform_0, window_bounds = array<i64: 8, 128>}, {transform_indices = @transform_1, window_bounds = array<i64: 8, 128>}]} {
    %c0 = arith.constant 0 : index
    %c0_0 = arith.constant 0 : index
    %0 = vector.load %arg1[%c0, %c0_0] : memref<8x128xf32, #tpu.memory_space<vmem>>, vector<8x128xf32>
    %1 = math.absf %0 : vector<8x128xf32>
    %cst = arith.constant 1.000000e+00 : f32
    %2 = vector.broadcast %cst : f32 to vector<8x128xf32>
    %3 = arith.addf %2, %1 : vector<8x128xf32>
    %4 = tpu.reciprocal %3 {approx = true} : vector<8x128xf32> -> vector<8x128xf32>
    %cst_1 = arith.constant 0.000000e+00 : f32
    %5 = vector.broadcast %cst_1 : f32 to vector<8x128xf32>
    %6 = arith.subf %5, %1 : vector<8x128xf32>
    %7 = math.exp %6 : vector<8x128xf32>
    %8 = arith.mulf %0, %7 : vector<8x128xf32>
    %9 = arith.mulf %8, %4 : vector<8x128xf32>
    %c0_2 = arith.constant 0 : index
    %c0_3 = arith.constant 0 : index
    %10 = vector.load %arg2[%c0_2, %c0_3] : memref<8x128xf32, #tpu.memory_space<vmem>>, vector<8x128xf32>
    tpu.vector_store %arg2[%c0_2, %c0_3], %9 {strides = array<i32>} : memref<8x128xf32, #tpu.memory_space<vmem>>, vector<8x128xf32>,
    return
  }
  func.func @transform_0(%arg0: i32) -> (i32, i32) {
    %c0_i32 = arith.constant 0 : i32
    %c0_i32_0 = arith.constant 0 : i32
    return %arg0, %c0_i32 : i32, i32
  }
  func.func @transform_1(%arg0: i32) -> (i32, i32) {
    %c0_i32 = arith.constant 0 : i32
    %c0_i32_0 = arith.constant 0 : i32
    return %arg0, %c0_i32 : i32, i32
  }
}

</mosaic_0001>

<bundles_post_ra>
// kernel: tpu_custom_call.1
= control target key start
LH: loop header
LB: loop body
LE: loop exit
PB: predicated region body
PF: predicated region fallthrough
CT: control target
= control target key end

     0   :  { %6 = vsyncpa [#allocation3], 0  ;;  %s559_s0 = inlined_call_operand.hbm [shape: f32[16,128], index: 0, kind: input, shape index: {}]   ;;  %s560_s1 = inlined_call_operand.hbm [shape: f32[16,128], index: 1, kind: output, shape index: {}]  }
   0x1   :  { %8 = vsyncpa [#allocation3 + $0x1], 0 }
   0x2   :  { %9 = vsyncpa [#allocation4], 0 }
   0x3   :  { %11 = vsyncpa [#allocation4 + $0x1], 0  ;;  %s398_s6 = smov 0   ;;  %s400_s7 = smov 0  }
   0x4   :  { %s402_s8 = smov 0   ;;  %s404_s9 = smov 0  }
   0x5 LB: > { %s419_s10 = sadd.s32 4294967295, %s384_s9   ;;  %s226_s11 = sadd.s32 4294967294, %s384_s9   ;;  %s384_s9 = sphi %s404_s9, %s575_s9   ;;  %s380_s8 = sphi %s402_s8, %s574_s8   ;;  %s376_s7 = sphi %s400_s7, %s573_s7   ;;  %s372_s6 = sphi %s398_s6, %s572_s6  }
   0x6   : > { %s423_s12 = sadd.s32 1, %s384_s9   ;;  %s24_s13 = sadd.s32 1, %s380_s8 }
   0x7   : > { %s21_s14 = ssub.s32 %s384_s9, %s423_s12  ;;  %p31_p0 = scmp.ne.s32.totalorder %s380_s8, %s376_s7 }
   0x8   : > { %p22_p1 = scmp.eq.s32.totalorder %s21_s14, 0  ;;  %p32_p2 = scmp.eq.s32.totalorder %s384_s9, 0 }
   0x9   : > { %p37_p3 = scmp.ne.s32.totalorder %s376_s7, %s372_s6  ;;  %p38_p4 = scmp.eq.s32.totalorder %s419_s10, 0 }
   0xa   : > { %s435_s15 = scalar_select %p22_p1, %s380_s8, %s24_s13  }
   0xb   : > { %p437_p5 = por %p32_p2, %p31_p0  ;;  %p441_p6 = por %p38_p4, %p37_p3 }
   0xc   : > { %p61_p7 = scmp.eq.s32.totalorder %s419_s10, 1  ;;  %p67_p8 = scmp.eq.s32.totalorder %s226_s11, 1 }
   0xd   : > { %p250_p10 = scmp.lt.s32.totalorder %s384_s9, 2  ;;  %s87_s20 = sand.u32 1, %s380_s8  }
   0xe   : > { %p448_p11 = por %p61_p7, %p31_p0  ;;  %p452_p12 = por %p67_p8, %p37_p3 }
   0xf   : > { %s230_s21 = sshll.u32 %s384_s9, 7  ;;  %s229_s22 = sshll.u32 %s87_s20, 3 }
  0x10   : > { %s564_s18 = scalar_select %p448_p11, 1, 0 }
  0x11   : > { %s565_s19 = scalar_select %p452_p12, 1, 0 }
  0x12   : > { %s461_s25 = scalar_lea.hbm %s559_s0, %s230_s21  ;;  %s91_s26 = scalar_lea.vmem [#allocation2], %s229_s22 }
  0x13   : > { %s98_s27 = sshll.u32 %s91_s26, 4  ;;  %p465_p13 = pnand %p250_p10, %p437_p5  ;;  %s469_s27 = int_to_ptr.vmem [resolvable:$true] %s98_s27 }
  0x14   : > { %s88_s29 = scalar_lea.sflag [#allocation3], %s87_s20  ;;  %s288_s30 = scalar_lea.hbm %s461_s25, 128 }
  0x15   : > { %p289_p2 = scmp.ne.s32.totalorder %s461_s25, %s288_s30  ;;  %p290_p3 = pneg %p465_p13 }
  0x16   : > { %s293_s4 = scalar_lea.hbm %s559_s0, 256  ;;  %p294_p5 = scmp.lt.u32.totalorder %s461_s25, %s559_s0 }
  0x17   : > { %p291_p4 = pnand %p290_p3, %p289_p2  ;;  %p295_p8 = scmp.lt.u32.totalorder %s293_s4, %s288_s30 }
  0x18   : > { %p297_p9 = scmp.lt.u32.totalorder %s288_s30, %s461_s25 }
  0x19   : > { %p292_p7 = pneg %p291_p4  ;;  %p296_p10 = por %p295_p8, %p294_p5 }
  0x1b   : > { %p298_p0 = por %p297_p9, %p296_p10 }
  0x1d   : > { %p299_p1 = pnand %p298_p0, %p292_p7 }
  0x1f   : > { %302 = shalt.err (!%p299_p1)
}
  0x20   : > { %s303_s13 = scalar_lea.vmem %s469_s27, 128  ;;  %s386_s14 = smov [#allocation2]  }
  0x21   : > { %p304_p2 = scmp.ne.s32.totalorder %s469_s27, %s303_s13  ;;  %s308_s16 = sshll.u32 %s386_s14, 4  ;;  %s309_s16 = int_to_ptr.vmem [resolvable:$false] %s308_s16 }
  0x22   : > { %s310_s20 = scalar_lea.vmem %s309_s16, 256  ;;  %p311_p11 = scmp.lt.s32.totalorder %s469_s27, %s309_s16 }
  0x23   : > { %p306_p4 = pnand %p304_p2, %p290_p3  ;;  %p312_p5 = scmp.lt.s32.totalorder %s310_s20, %s303_s13 }
  0x25   : > { %p307_p12 = pneg %p306_p4  ;;  %p313_p8 = por %p312_p5, %p311_p11 }
  0x27   : > { %p314_p9 = pnand %p313_p8, %p307_p12 }
  0x29   : > { %317 = shalt.err (!%p314_p9)
}
  0x2a   : > { %245 = dma.hbm_to_vmem [thread:$0]  (!%p465_p13), %s461_s25, 128, %s469_s27, %s88_s29  }
  0x2b   : > { %p567_p0 = scmp.lt.s32.totalorder %s384_s9, 3  ;;  %p568_p1 = scmp.ge.s32.totalorder %s384_s9, 1 }
  0x2d   : > { %p104_p3 = pnand %p568_p1, %p567_p0 }
  0x2e   : > { %s503_s21 = sand.u32 (!%p104_p3), 1, %s376_s7  }
  0x2f   : > { %107 = sbr.rel (%p104_p3) target bundleno = 91 (0x5b), region = 24  ;;  %s232_s22 = sshll.u32 (!%p104_p3), %s503_s21, 3 }
  0x30   : > { %s110_s23 = scalar_lea.sflag (!%p104_p3), [#allocation3], %s503_s21  ;;  %s113_s24 = scalar_lea.vmem (!%p104_p3), [#allocation2], %s232_s22 }
  0x36   : > { %363 = dma.done.wait (%p441_p6), %s110_s23, 128  }
  0x37   : > { %365 = vsyncadd (%p441_p6), %s110_s23, 4294967168  ;;  %v132_v0 = vld [vmem:[%s113_s24] sm:$0xff]  ;;  %s131_s25 = scalar_lea.vmem [#allocation5], %s232_s22  ;;  %s235_s27 = sshll.u32 %s419_s10, 7 }
  0x38   : > { %v133_v1 = vand.u32 2147483647, %v132_v0  ;;  %s156_s26 = sshll.u32 %s131_s25, 4  ;;  %s517_s29 = scalar_lea.hbm %s560_s1, %s235_s27  ;;  %s512_s26 = int_to_ptr.vmem [resolvable:$true] %s156_s26 }
  0x39   : > { %s143_s30 = scalar_lea.sflag [#allocation4], %s503_s21  ;;  %s318_s2 = scalar_lea.vmem %s512_s26, 128 }
  0x3a   : > { %v134_v2 = vadd.f32 1.0, %v133_v1  ;;  %v136_v3 = vsub.f32 0.0, %v133_v1  ;;  %p319_p6 = scmp.ne.s32.totalorder %s512_s26, %s318_s2  ;;  %p569_p11 = scmp.ne.s32.totalorder %s564_s18, 0 }
  0x3b   : > { %s387_s10 = smov [#allocation5]  }
  0x3c   : > { %v137_v4 = vmul.f32 1.442695, %v136_v3  ;;  %284 = vrcp.f32 %v134_v2  ;;  %p320_p12 = pnand %p319_p6, %p569_p11  ;;  %s322_s3 = sshll.u32 %s387_s10, 4  ;;  %s323_s3 = int_to_ptr.vmem [resolvable:$false] %s322_s3 }
  0x3d   : > { %s324_s4 = scalar_lea.vmem %s323_s3, 256  ;;  %p325_p7 = scmp.lt.s32.totalorder %s512_s26, %s323_s3 }
  0x3e   : > { %286 = vpow2.f32 %v137_v4  ;;  %p321_p13 = pneg %p320_p12  ;;  %p326_p10 = scmp.lt.s32.totalorder %s324_s4, %s318_s2 }
  0x40   : > { %p327_p2 = por %p326_p10, %p325_p7 }
  0x42   : > { %p328_p4 = pnand %p327_p2, %p321_p13 }
  0x46   : > { %v285_v5 = vpop.eup %284 }
  0x48   : > { %v287_v6 = vpop.eup %286 }
  0x49   : > { %v139_v7 = vmul.f32 %v287_v6, %v132_v0 }
  0x4b   : > { %v140_v8 = vmul.f32 %v285_v5, %v139_v7 }
  0x4d   : > { %141 = vst [vmem:[%s131_s25] sm:$0xff] %v140_v8 }
  0x4e   : > { %331 = shalt.err (!%p328_p4)
}
  0x4f   : > { %s332_s5 = scalar_lea.hbm %s517_s29, 128  ;;  %s336_s14 = scalar_lea.hbm %s560_s1, 256 }
  0x50   : > { %p333_p5 = scmp.ne.s32.totalorder %s517_s29, %s332_s5  ;;  %p337_p0 = scmp.lt.u32.totalorder %s517_s29, %s560_s1 }
  0x51   : > { %p338_p1 = scmp.lt.u32.totalorder %s336_s14, %s332_s5  ;;  %p340_p6 = scmp.lt.u32.totalorder %s332_s5, %s517_s29 }
  0x52   : > { %p334_p8 = pnand %p333_p5, %p569_p11 }
  0x53   : > { %p339_p3 = por %p338_p1, %p337_p0 }
  0x54   : > { %p335_p9 = pneg %p334_p8 }
  0x55   : > { %p341_p12 = por %p340_p6, %p339_p3 }
  0x57   : > { %p342_p13 = pnand %p341_p12, %p335_p9 }
  0x59   : > { %345 = shalt.err (!%p342_p13)
}
  0x5a   : > { %240 = dma.vmem_to_hbm [thread:$0]  (%p569_p11), %s512_s26, 128, %s517_s29, %s143_s30  }
  0x5b PF: > { %s168_s21 = sand.u32 1, %s372_s6   ;;  %p570_p7 = scmp.ne.s32.totalorder %s565_s19, 0 }
  0x5c   : > { %p571_p10 = scmp.ge.s32.totalorder %s384_s9, 2  ;;  %s169_s22 = scalar_lea.sflag [#allocation4], %s168_s21 }
  0x5e   : > { %p247_p2 = pnand %p571_p10, %p570_p7 }
  0x60   : > { %367 = dma.done.wait (!%p247_p2), %s169_s22, 128  }
  0x61   : > { %369 = vsyncadd (!%p247_p2), %s169_s22, 4294967168  ;;  %p14_p4 = scmp.ge.s32.totalorder %s423_s12, 4   ;;  %s572_s6 = smov %s376_s7 }
  0x62   : > { %s573_s7 = smov %s380_s8  ;;  %s574_s8 = smov %s435_s15 }
  0x63   : > { %s575_s9 = smov %s423_s12  ;;  %16 = sbr.rel (!%p14_p4) target bundleno = 5 (0x5), region = 69 }
  0x6a   :  { %174 = vsyncpa [#allocation3], 1 }
  0x6b   :  { %176 = vsyncpa [#allocation3 + $0x1], 1 }
  0x6c   :  { %177 = vsyncpa [#allocation4], 1 }
  0x6d   :  { %179 = vsyncpa [#allocation4 + $0x1], 1 }

</bundles_post_ra>
